<compile_context>
chip_gen: v6e
topology: v6e:2x2x1
jax: 0.10.0
libtpu: 0.0.40
codegen_flags: <defaults>
</compile_context>

<pallas_src>
import functools

import jax
import jax.numpy as jnp
from jax.experimental import pallas as pl
from jax.experimental.pallas import tpu as pltpu


def _round_up(x: int, m: int) -> int:
    return ((x + m - 1) // m) * m


def _fused_mlp_kernel(x_ref, w_ref, b_ref, o_ref, *, num_layers: int,
                      negative_slope: float, plain_last: bool):
    # x_ref: (TILE_N, C_pad) bf16   w_ref: (L, C_pad, C_pad) bf16   b_ref: (L, 1, C_pad) f32
    h_bf16 = x_ref[...]                              # already bf16 MXU operand
    for l in range(num_layers):                      # static unroll; layer stack stays on-chip
        y = jnp.dot(h_bf16, w_ref[l],
                    preferred_element_type=jnp.float32)   # MXU, f32 accumulate
        y = y + b_ref[l]                                   # (1, C_pad) broadcast, f32 (VPU)
        apply_act = (not plain_last) or (l < num_layers - 1)
        if apply_act:
            y = jnp.where(y >= 0, y, negative_slope * y)   # leaky_relu in f32
        if l == num_layers - 1:
            o_ref[...] = y.astype(o_ref.dtype)             # lane-dense f32 store
        else:
            h_bf16 = y.astype(jnp.bfloat16)                # next MXU operand


def fused_mlp_forward(x, w_stack, b_stack, channel_list, *, negative_slope=0.01,
                      plain_last=False, tile_n=512):
    """Run the whole MLP in one Pallas kernel.

    x:        [N, C_in] float32
    w_stack:  [L, C_pad, C_pad] bfloat16 (zero-padded, already transposed to y = x @ W)
    b_stack:  [L, 1, C_pad] float32 (zero-padded)
    """
    n, c_in = x.shape
    num_layers, c_pad, _ = w_stack.shape
    c_out = channel_list[-1]
    assert c_in == channel_list[0]

    # Resident parameter footprint (VMEM).
    param_bytes = num_layers * c_pad * c_pad * 2 + num_layers * c_pad * 4
    vmem_budget = 48 * 2**20          # conservative: fits v7x's 64 MiB per-TC VMEM
    assert param_bytes < vmem_budget, "stacked weights do not fit VMEM; need K/N tiling"

    # Row tile: multiple of 8 sublanes; don't exceed (padded) batch; fit VMEM with
    # double-buffered bf16 input tiles + f32 output tiles alongside the resident params.
    tile_n = min(tile_n, _round_up(n, 8))
    tile_n = max(_round_up(tile_n, 8), 8)
    def _tiles_bytes(t):
        return 2 * t * c_pad * 2 + 2 * t * c_pad * 4     # 2x bf16 in + 2x f32 out buffers
    while tile_n > 8 and param_bytes + _tiles_bytes(tile_n) > vmem_budget:
        tile_n = _round_up(tile_n // 2, 8)
    n_pad = _round_up(n, tile_n)

    # Pad x to lane-dense [n_pad, c_pad] and cast once to bf16 (padding zeros stay zero).
    x_pad = jnp.pad(x.astype(jnp.bfloat16), ((0, n_pad - n), (0, c_pad - c_in)))

    grid = (n_pad // tile_n,)

    vmem_limit = int(min(max(2 * (param_bytes + _tiles_bytes(tile_n)), 16 * 2**20),
                         60 * 2**20))

    # Advisory cost estimate for XLA scheduling (unpadded math / traffic).
    flops = sum(2 * n * ci * co for ci, co in zip(channel_list[:-1], channel_list[1:]))
    bytes_accessed = (n * c_in * 2
                      + sum(ci * co * 2 for ci, co in zip(channel_list[:-1], channel_list[1:]))
                      + sum(co * 4 for co in channel_list[1:])
                      + n * c_out * 4)

    kernel = functools.partial(
        _fused_mlp_kernel, num_layers=num_layers,
        negative_slope=negative_slope, plain_last=plain_last)

    out_pad = pl.pallas_call(
        kernel,
        out_shape=jax.ShapeDtypeStruct((n_pad, c_pad), jnp.float32),
        grid_spec=pltpu.PrefetchScalarGridSpec(
            num_scalar_prefetch=0,
            grid=grid,
            in_specs=[
                # x: row-tiled bf16, pipelined against compute.
                pl.BlockSpec((tile_n, c_pad), lambda i: (i, 0)),
                # weights/biases: constant index_map -> VMEM-resident across row tiles.
                pl.BlockSpec((num_layers, c_pad, c_pad), lambda i: (0, 0, 0)),
                pl.BlockSpec((num_layers, 1, c_pad), lambda i: (0, 0, 0)),
            ],
            out_specs=pl.BlockSpec((tile_n, c_pad), lambda i: (i, 0)),
        ),
        compiler_params=pltpu.CompilerParams(
            dimension_semantics=("parallel",),   # shard row tiles across TCs (v7x)
            vmem_limit_bytes=vmem_limit,
        ),
        cost_estimate=pl.CostEstimate(
            flops=flops, transcendentals=0, bytes_accessed=bytes_accessed),
    )(x_pad, w_stack, b_stack)

    # Strip padding (rows and lanes) outside the kernel.
    return out_pad[:n, :c_out]


class MLPPallas:
    """JAX/Pallas equivalent of the PyTorch MLP (norm=False, plain_last=False, eval mode)."""

    def __init__(self, channel_list, key, *, negative_slope=0.01, plain_last=False):
        assert len(channel_list) >= 2
        self.channel_list = list(channel_list)
        self.negative_slope = negative_slope
        self.plain_last = plain_last

        self.weights = []   # [C_in, C_out] f32 (transposed w.r.t. torch's [out, in])
        self.biases = []    # [C_out] f32
        for c_in, c_out in zip(channel_list[:-1], channel_list[1:]):
            key, wk, bk = jax.random.split(key, 3)
            bound = 1.0 / (c_in ** 0.5)   # torch Linear reset_parameters scale
            w = jax.random.uniform(wk, (c_in, c_out), jnp.float32, -bound, bound)
            b = jax.random.uniform(bk, (c_out,), jnp.float32, -bound, bound)
            self.weights.append(w)
            self.biases.append(b)

        # Pre-pack lane-dense, zero-padded stacked parameters once (bf16 weights, f32 bias).
        num_layers = len(self.weights)
        c_max = max(self.channel_list)
        self.c_pad = max(_round_up(c_max, 128), 128)
        w_stack = jnp.zeros((num_layers, self.c_pad, self.c_pad), jnp.bfloat16)
        b_stack = jnp.zeros((num_layers, 1, self.c_pad), jnp.float32)
        for l, (w, b) in enumerate(zip(self.weights, self.biases)):
            ci, co = w.shape
            w_stack = w_stack.at[l, :ci, :co].set(w.astype(jnp.bfloat16))
            b_stack = b_stack.at[l, 0, :co].set(b)
        self.w_stack = w_stack
        self.b_stack = b_stack

    def __call__(self, x, *, tile_n=512):
        return fused_mlp_forward(
            x, self.w_stack, self.b_stack, self.channel_list,
            negative_slope=self.negative_slope, plain_last=self.plain_last,
            tile_n=tile_n)


if __name__ == "__main__":
    key = jax.random.PRNGKey(0)
    key, xkey = jax.random.split(key)

    channel_list = [16, 32, 8]   # in -> hidden -> out
    n = 24                       # batch (rows); tile_n=8 below exercises a 3-step row grid

    x = jax.random.normal(xkey, (n, channel_list[0]), jnp.float32)

    mlp = MLPPallas(channel_list, key)
    out = mlp(x, tile_n=8)
    out = jax.block_until_ready(out)

    # Plain-JAX reference of the same math (bf16 MXU operands, f32 accumulate/epilogue).
    ref = x
    for w, b in zip(mlp.weights, mlp.biases):
        ref = jnp.dot(ref.astype(jnp.bfloat16), w.astype(jnp.bfloat16),
                      preferred_element_type=jnp.float32) + b
        ref = jnp.where(ref >= 0, ref, 0.01 * ref)

    assert out.shape == (n, channel_list[-1])
    assert jnp.allclose(out, ref, atol=2e-3, rtol=2e-3), float(jnp.max(jnp.abs(out - ref)))

    print("KERNEL_OK")
</pallas_src>

<mosaic_0001>
module attributes {stable_mosaic.version = 11 : i64} {
  func.func @_fused_mlp_kernel(%arg0: i32, %arg1: memref<8x128xbf16, #tpu.memory_space<vmem>>, %arg2: memref<2x128x128xbf16, #tpu.memory_space<vmem>>, %arg3: memref<2x1x128xf32, #tpu.memory_space<vmem>>, %arg4: memref<8x128xf32, #tpu.memory_space<vmem>>) attributes {dimension_semantics = [#tpu.dimension_semantics<parallel>], iteration_bounds = array<i64: 3>, scalar_prefetch = 0 : i64, scratch_operands = 0 : i64, tpu.core_type = #tpu.core_type<tc>, window_params = [{transform_indices = @transform_0, window_bounds = array<i64: 8, 128>}, {pipeline_mode = #tpu.pipeline_mode<synchronous>, transform_indices = @transform_1, window_bounds = array<i64: 2, 128, 128>}, {pipeline_mode = #tpu.pipeline_mode<synchronous>, transform_indices = @transform_2, window_bounds = array<i64: 2, 1, 128>}, {transform_indices = @transform_3, window_bounds = array<i64: 8, 128>}]} {
    %c0 = arith.constant 0 : index
    %c0_0 = arith.constant 0 : index
    %0 = vector.load %arg1[%c0, %c0_0] : memref<8x128xbf16, #tpu.memory_space<vmem>>, vector<8x128xbf16>
    %c0_1 = arith.constant 0 : index
    %c0_2 = arith.constant 0 : index
    %c0_3 = arith.constant 0 : index
    %1 = vector.load %arg2[%c0_1, %c0_2, %c0_3] : memref<2x128x128xbf16, #tpu.memory_space<vmem>>, vector<1x128x128xbf16>
    %2 = vector.shape_cast %1 : vector<1x128x128xbf16> to vector<128x128xbf16>
    %cst = arith.constant dense<0.000000e+00> : vector<8x128xf32>
    %3 = tpu.matmul %0, %2, %cst {dimension_numbers = #tpu.dot_dimension_numbers<[1], [0], [0], [1], [0, 0, 1, 1], [], []>} : vector<8x128xbf16>, vector<128x128xbf16>, vector<8x128xf32> -> vector<8x128xf32>
    %c0_4 = arith.constant 0 : index
    %c0_5 = arith.constant 0 : index
    %c0_6 = arith.constant 0 : index
    %4 = vector.load %arg3[%c0_4, %c0_5, %c0_6] : memref<2x1x128xf32, #tpu.memory_space<vmem>>, vector<1x1x128xf32>
    %5 = vector.shape_cast %4 : vector<1x1x128xf32> to vector<1x128xf32>
    %6 = vector.broadcast %5 : vector<1x128xf32> to vector<8x128xf32>
    %7 = arith.addf %3, %6 : vector<8x128xf32>
    %cst_7 = arith.constant 0.000000e+00 : f32
    %8 = vector.broadcast %cst_7 : f32 to vector<8x128xf32>
    %9 = arith.cmpf oge, %7, %8 : vector<8x128xf32>
    %cst_8 = arith.constant 0.00999999977 : f32
    %10 = vector.broadcast %cst_8 : f32 to vector<8x128xf32>
    %11 = arith.mulf %10, %7 : vector<8x128xf32>
    %12 = arith.select %9, %7, %11 : vector<8x128xi1>, vector<8x128xf32>
    %13 = arith.truncf %12 : vector<8x128xf32> to vector<8x128xbf16>
    %c1 = arith.constant 1 : index
    %c0_9 = arith.constant 0 : index
    %c0_10 = arith.constant 0 : index
    %14 = vector.load %arg2[%c1, %c0_9, %c0_10] : memref<2x128x128xbf16, #tpu.memory_space<vmem>>, vector<1x128x128xbf16>
    %15 = vector.shape_cast %14 : vector<1x128x128xbf16> to vector<128x128xbf16>
    %cst_11 = arith.constant dense<0.000000e+00> : vector<8x128xf32>
    %16 = tpu.matmul %13, %15, %cst_11 {dimension_numbers = #tpu.dot_dimension_numbers<[1], [0], [0], [1], [0, 0, 1, 1], [], []>} : vector<8x128xbf16>, vector<128x128xbf16>, vector<8x128xf32> -> vector<8x128xf32>
    %c1_12 = arith.constant 1 : index
    %c0_13 = arith.constant 0 : index
    %c0_14 = arith.constant 0 : index
    %17 = vector.load %arg3[%c1_12, %c0_13, %c0_14] : memref<2x1x128xf32, #tpu.memory_space<vmem>>, vector<1x1x128xf32>
    %18 = vector.shape_cast %17 : vector<1x1x128xf32> to vector<1x128xf32>
    %19 = vector.broadcast %18 : vector<1x128xf32> to vector<8x128xf32>
    %20 = arith.addf %16, %19 : vector<8x128xf32>
    %cst_15 = arith.constant 0.000000e+00 : f32
    %21 = vector.broadcast %cst_15 : f32 to vector<8x128xf32>
    %22 = arith.cmpf oge, %20, %21 : vector<8x128xf32>
    %cst_16 = arith.constant 0.00999999977 : f32
    %23 = vector.broadcast %cst_16 : f32 to vector<8x128xf32>
    %24 = arith.mulf %23, %20 : vector<8x128xf32>
    %25 = arith.select %22, %20, %24 : vector<8x128xi1>, vector<8x128xf32>
    %c0_17 = arith.constant 0 : index
    %c0_18 = arith.constant 0 : index
    %26 = vector.load %arg4[%c0_17, %c0_18] : memref<8x128xf32, #tpu.memory_space<vmem>>, vector<8x128xf32>
    tpu.vector_store %arg4[%c0_17, %c0_18], %25 {strides = array<i32>} : memref<8x128xf32, #tpu.memory_space<vmem>>, vector<8x128xf32>,
    return
  }
  func.func @transform_0(%arg0: i32) -> (i32, i32) {
    %c0_i32 = arith.constant 0 : i32
    %c0_i32_0 = arith.constant 0 : i32
    return %arg0, %c0_i32 : i32, i32
  }
  func.func @transform_1(%arg0: i32) -> (i32, i32, i32) {
    %c0_i32 = arith.constant 0 : i32
    %c0_i32_0 = arith.constant 0 : i32
    %c0_i32_1 = arith.constant 0 : i32
    %c0_i32_2 = arith.constant 0 : i32
    return %c0_i32, %c0_i32_0, %c0_i32_1 : i32, i32, i32
  }
  func.func @transform_2(%arg0: i32) -> (i32, i32, i32) {
    %c0_i32 = arith.constant 0 : i32
    %c0_i32_0 = arith.constant 0 : i32
    %c0_i32_1 = arith.constant 0 : i32
    %c0_i32_2 = arith.constant 0 : i32
    return %c0_i32, %c0_i32_0, %c0_i32_1 : i32, i32, i32
  }
  func.func @transform_3(%arg0: i32) -> (i32, i32) {
    %c0_i32 = arith.constant 0 : i32
    %c0_i32_0 = arith.constant 0 : i32
    return %arg0, %c0_i32 : i32, i32
  }
}

</mosaic_0001>

<bundles_post_ra>
// kernel: tpu_custom_call.1
= control target key start
LH: loop header
LB: loop body
LE: loop exit
PB: predicated region body
PF: predicated region fallthrough
CT: control target
= control target key end

     0   :  { %8 = vsyncpa [#allocation3], 0  ;;  %s1022_s0 = inlined_call_operand.hbm [shape: bf16[24,128], index: 0, kind: input, shape index: {}]   ;;  %s1023_s1 = inlined_call_operand.hbm [shape: bf16[2,128,128], index: 1, kind: input, shape index: {}]   ;;  %s1024_s2 = inlined_call_operand.vmem [shape: f32[2,1,128], index: 2, kind: input, shape index: {}]   ;;  %s1025_s3 = inlined_call_operand.hbm [shape: f32[24,128], index: 3, kind: output, shape index: {}]  }
   0x1   :  { %10 = vsyncpa [#allocation3 + $0x1], 0 }
   0x2   :  { %11 = vsyncpa [#allocation6], 0 }
   0x3   :  { %12 = vsyncpa [#allocation4], 0 }
   0x4   :  { %14 = vsyncpa [#allocation4 + $0x1], 0  ;;  %s848_s12 = smov 0   ;;  %s850_s13 = smov 0  }
   0x5   :  { %s852_s14 = smov 0   ;;  %s854_s15 = smov 0  }
   0x6 LB: > { %s869_s16 = sadd.s32 4294967295, %s819_s15   ;;  %s529_s17 = sadd.s32 4294967294, %s819_s15   ;;  %s819_s15 = sphi %s854_s15, %s1046_s15   ;;  %s815_s14 = sphi %s852_s14, %s1045_s14   ;;  %s811_s13 = sphi %s850_s13, %s1044_s13   ;;  %s807_s12 = sphi %s848_s12, %s1043_s12  }
   0x7   : > { %p40_p0 = scmp.ne.s32.totalorder %s811_s13, %s807_s12  ;;  %p1026_p1 = scmp.eq.s32.totalorder %s869_s16, 0 }
   0x8   : > { %p112_p3 = scmp.eq.s32.totalorder %s529_s17, 2  ;;  %p530_p5 = scmp.ge.s32.totalorder %s819_s15, 1 }
   0x9   : > { %p878_p4 = por %p1026_p1, %p40_p0  ;;  %p119_p7 = scmp.lt.s32.totalorder %s819_s15, 4 }
   0xa   : > { %p883_p6 = por %p112_p3, %p40_p0  ;;  %s821_s21 = smov [#allocation5]  }
   0xb   : > { %s1030_s18 = scalar_select %p878_p4, 1, 0 }
   0xc   : > { %s1031_s19 = scalar_select %p883_p6, 1, 0 }
   0xd   : > { %p888_p8 = pnand %p530_p5, %p119_p7  ;;  %s131_s22 = sshll.u32 %s821_s21, 4  ;;  %s132_s22 = int_to_ptr.vmem [resolvable:$true] %s131_s22 }
   0xe   : > { %s901_s24 = sadd.s32 1, %s819_s15   ;;  %s27_s25 = sadd.s32 1, %s815_s14 }
   0xf   : > { %s1032_s20 = scalar_select %p888_p8, 1, 0 }
  0x10   : > { %p628_p9 = pneg %p888_p8  ;;  %s24_s26 = ssub.s32 %s819_s15, %s901_s24 }
  0x11   : > { %s708_s27 = scalar_lea.vmem %s132_s22, 2048  ;;  %p716_p3 = scmp.lt.s32.totalorder %s132_s22, %s132_s22 }
  0x12   : > { %p896_p10 = pnand %p628_p9, %p1026_p1  ;;  %p709_p12 = scmp.ne.s32.totalorder %s132_s22, %s708_s27 }
  0x13   : > { %p717_p5 = scmp.lt.s32.totalorder %s708_s27, %s708_s27 }
  0x14   : > { %p699_p11 = pneg %p896_p10 }
  0x15   : > { %p718_p7 = por %p717_p5, %p716_p3 }
  0x16   : > { %p711_p13 = pnand %p709_p12, %p699_p11 }
  0x18   : > { %p712_p0 = pneg %p711_p13 }
  0x1a   : > { %p719_p2 = pnand %p718_p7, %p712_p0 }
  0x1c   : > { %722 = shalt.err (!%p719_p2)
}
  0x1d   : > { %s822_s28 = smov 64   ;;  %s823_s29 = smov 4  }
  0x1e   : > { %631 = dma.hbm_to_vmem [thread:$0]  (!%p896_p10), %s1023_s1, 2048, %s132_s22, [#allocation6], %s822_s28, %s822_s28, %s823_s29  }
  0x1f   : > { %p25_p9 = scmp.eq.s32.totalorder %s24_s26, 0  ;;  %p34_p11 = scmp.ne.s32.totalorder %s815_s14, %s811_s13 }
  0x20   : > { %p35_p12 = scmp.eq.s32.totalorder %s819_s15, 0  ;;  %p641_p2 = scmp.lt.s32.totalorder %s819_s15, 3 }
  0x21   : > { %s918_s5 = scalar_select %p25_p9, %s815_s14, %s27_s25  }
  0x22   : > { %p36_p13 = por %p35_p12, %p34_p11  ;;  %p1034_p0 = scmp.eq.s32.totalorder %s869_s16, 2 }
  0x23   : > { %s148_s7 = sand.u32 1, %s815_s14   ;;  %s534_s8 = sshll.u32 %s819_s15, 6 }
  0x24   : > { %p922_p3 = por %p1034_p0, %p34_p11  ;;  %s533_s9 = sshll.u32 %s148_s7, 2 }
  0x25   : > { %s931_s17 = scalar_lea.hbm %s1022_s0, %s534_s8  ;;  %s152_s21 = scalar_lea.vmem [#allocation2], %s533_s9 }
  0x26   : > { %s1035_s6 = scalar_select %p922_p3, 1, 0 }
  0x27   : > { %s159_s22 = sshll.u32 %s152_s21, 4  ;;  %p933_p10 = pnand %p641_p2, %p36_p13  ;;  %s160_s22 = int_to_ptr.vmem [resolvable:$true] %s159_s22 }
  0x28   : > { %s149_s25 = scalar_lea.sflag [#allocation3], %s148_s7  ;;  %s723_s26 = scalar_lea.hbm %s931_s17, 64 }
  0x29   : > { %p724_p5 = scmp.ne.s32.totalorder %s931_s17, %s723_s26  ;;  %p725_p7 = pneg %p933_p10 }
  0x2a   : > { %s728_s29 = scalar_lea.hbm %s1022_s0, 192  ;;  %p729_p12 = scmp.lt.s32.totalorder %s931_s17, %s1022_s0 }
  0x2b   : > { %p726_p9 = pnand %p725_p7, %p724_p5  ;;  %p730_p2 = scmp.lt.s32.totalorder %s728_s29, %s723_s26 }
  0x2d   : > { %p727_p11 = pneg %p726_p9  ;;  %p731_p13 = por %p730_p2, %p729_p12 }
  0x2f   : > { %p732_p0 = pnand %p731_p13, %p727_p11 }
  0x31   : > { %735 = shalt.err (!%p732_p0)
}
  0x32   : > { %s736_s8 = scalar_lea.vmem %s160_s22, 64  ;;  %s824_s7 = smov [#allocation2]  }
  0x33   : > { %p737_p1 = scmp.ne.s32.totalorder %s160_s22, %s736_s8  ;;  %s741_s9 = sshll.u32 %s824_s7, 4  ;;  %s742_s9 = int_to_ptr.vmem [resolvable:$false] %s741_s9 }
  0x34   : > { %s743_s10 = scalar_lea.vmem %s742_s9, 128  ;;  %p744_p5 = scmp.lt.s32.totalorder %s160_s22, %s742_s9 }
  0x35   : > { %p739_p6 = pnand %p737_p1, %p725_p7  ;;  %p745_p9 = scmp.lt.s32.totalorder %s743_s10, %s736_s8 }
  0x37   : > { %p740_p3 = pneg %p739_p6  ;;  %p746_p4 = por %p745_p9, %p744_p5 }
  0x39   : > { %p747_p8 = pnand %p746_p4, %p740_p3 }
  0x3b   : > { %750 = shalt.err (!%p747_p8)
}
  0x3c   : > { %635 = dma.hbm_to_vmem [thread:$0]  (!%p933_p10), %s931_s17, 64, %s160_s22, %s149_s25  }
  0x3d   : > { %p1037_p11 = scmp.ne.s32.totalorder %s1032_s20, 0 }
  0x3e   : > { %s954_s11 = sand.u32 (!%p1037_p11), 1, %s811_s13   ;;  %p1038_p1 = scmp.ne.s32.totalorder (!%p1037_p11), %s1030_s18, 0 }
  0x3f   : > { %168 = sbr.rel (%p1037_p11) target bundleno = 517 (0x205), region = 32  ;;  %s536_s21 = sshll.u32 (!%p1037_p11), %s954_s11, 2 }
  0x40   : > { %s171_s26 = scalar_lea.sflag (!%p1037_p11), [#allocation3], %s954_s11  ;;  %s958_s27 = scalar_lea.vmem (!%p1037_p11), [#allocation2], %s536_s21 }
  0x44   : > { %794 = dma.done.wait (%p1038_p1), %s171_s26, 64  }
  0x45   : > { %796 = vsyncadd (%p1038_p1), %s171_s26, 4294967232  ;;  %p1039_p4 = scmp.eq.s32.totalorder %s869_s16, 0 }
  0x47   : > { %798 = dma.done.wait (%p1039_p4), [#allocation6], 2048   ;;  %p1040_p6 = pmov %p1039_p4 }
  0x48   : > { %v825_v0 = vmov 0.0   ;;  %vm826_vm0 = vmmov 0   ;;  %v681_v1 = vld [vmem:[#allocation5 + $0x38] sm:$0xff]   ;;  %v682_v2 = vld [vmem:[#allocation5 + $0x30] sm:$0xff]   ;;  %v683_v3 = vld [vmem:[#allocation5 + $0x28] sm:$0xff]   ;;  %s538_s17 = sshll.u32 %s954_s11, 3 }
  0x49   : > { %800 = vsyncadd (%p1040_p6), [#allocation6], 4294965248  ;;  %580 = vmatprep.subr.bf16.mxu0 %v825_v0  ;;  %596 = vmatprep.mubr.msk.bf16.mxu0 %vm826_vm0, %v825_v0  ;;  %v689_v4 = vld [vmem:[#allocation5 + $0x78] sm:$0xff]   ;;  %v684_v5 = vld [vmem:[#allocation5 + $0x20] sm:$0xff]   ;;  %s559_s25 = sshll.u32 %s869_s16, 7  ;;  %s200_s28 = scalar_lea.vmem [#allocation7], %s538_s17 }
  0x4a   : > { %600 = vmatprep.subr.bf16.mxu1 %v825_v0  ;;  %616 = vmatprep.mubr.msk.bf16.mxu1 %vm826_vm0, %v825_v0  ;;  %v690_v6 = vld [vmem:[#allocation5 + $0x70] sm:$0xff]   ;;  %v685_v7 = vld [vmem:[#allocation5 + $0x18] sm:$0xff]   ;;  %v691_v8 = vld [vmem:[#allocation5 + $0x68] sm:$0xff]   ;;  %s449_s29 = sshll.u32 %s200_s28, 4  ;;  %s980_s8 = scalar_lea.hbm %s1025_s3, %s559_s25  ;;  %s982_s29 = int_to_ptr.vmem [resolvable:$true] %s449_s29 }
  0x4b   : > { %581 = vmatpush3.bf16.msra.mxu0 %v681_v1  ;;  %601 = vmatpush3.bf16.msra.mxu1 %v689_v4  ;;  %v686_v9 = vld [vmem:[#allocation5 + $0x10] sm:$0xff]   ;;  %v692_v10 = vld [vmem:[#allocation5 + $0x60] sm:$0xff]   ;;  %v687_v11 = vld [vmem:[#allocation5 + $0x8] sm:$0xff]   ;;  %s436_s16 = scalar_lea.sflag [#allocation4], %s954_s11  ;;  %s751_s7 = scalar_lea.vmem %s982_s29, 128 }
  0x4c   : > { %582 = vmatprep.subr.bf16.mxu0 %v825_v0  ;;  %602 = vmatprep.subr.bf16.mxu1 %v825_v0  ;;  %v693_v12 = vld [vmem:[#allocation5 + $0x58] sm:$0xff]   ;;  %v688_v13 = vld [vmem:[#allocation5] sm:$0xff]   ;;  %v694_v14 = vld [vmem:[#allocation5 + $0x50] sm:$0xff]   ;;  %p752_p8 = scmp.ne.s32.totalorder %s982_s29, %s751_s7  ;;  %p1041_p3 = scmp.ne.s32.totalorder %s1035_s6, 0 }
  0x4d   : > { %v202_v15 = vld [vmem:[%s958_s27] sm:$0xf]  ;;  %v695_v16 = vld [vmem:[#allocation5 + $0x48] sm:$0xff]   ;;  %v696_v17 = vld [vmem:[#allocation5 + $0x40] sm:$0xff]   ;;  %s827_s9 = smov [#allocation7]  }
  0x4e   : > { %v539_v18 = vld [vmem:[%s1024_s2] ss:$0 sm:$0xff]  ;;  %v549_v27 = vld [vmem:[%s1024_s2 + $0x1] ss:$0 sm:$0xff]  ;;  %p753_p10 = pnand %p752_p8, %p1041_p3  ;;  %s755_s10 = sshll.u32 %s827_s9, 4  ;;  %s756_s10 = int_to_ptr.vmem [resolvable:$false] %s755_s10 }
  0x4f   : > { %583 = vmatpush3.bf16.msra.mxu0 %v682_v2  ;;  %603 = vmatpush3.bf16.msra.mxu1 %v690_v6  ;;  %s757_s21 = scalar_lea.vmem %s756_s10, 256  ;;  %p758_p12 = scmp.lt.s32.totalorder %s982_s29, %s756_s10 }
  0x50   : > { %584 = vmatprep.subr.bf16.mxu0 %v825_v0  ;;  %604 = vmatprep.subr.bf16.mxu1 %v825_v0  ;;  %p754_p7 = pneg %p753_p10  ;;  %p759_p2 = scmp.lt.s32.totalorder %s757_s21, %s751_s7 }
  0x52   : > { %p760_p13 = por %p759_p2, %p758_p12 }
  0x53   : > { %585 = vmatpush3.bf16.msra.mxu0 %v683_v3  ;;  %605 = vmatpush3.bf16.msra.mxu1 %v691_v8 }
  0x54   : > { %586 = vmatprep.subr.bf16.mxu0 %v825_v0  ;;  %606 = vmatprep.subr.bf16.mxu1 %v825_v0  ;;  %p761_p0 = pnand %p760_p13, %p754_p7 }
  0x57   : > { %587 = vmatpush3.bf16.msra.mxu0 %v684_v5  ;;  %607 = vmatpush3.bf16.msra.mxu1 %v692_v10 }
  0x58   : > { %588 = vmatprep.subr.bf16.mxu0 %v825_v0  ;;  %608 = vmatprep.subr.bf16.mxu1 %v825_v0 }
  0x5b   : > { %589 = vmatpush3.bf16.msra.mxu0 %v685_v7  ;;  %609 = vmatpush3.bf16.msra.mxu1 %v693_v12 }
  0x5c   : > { %590 = vmatprep.subr.bf16.mxu0 %v825_v0  ;;  %610 = vmatprep.subr.bf16.mxu1 %v825_v0 }
  0x5f   : > { %591 = vmatpush3.bf16.msra.mxu0 %v686_v9  ;;  %611 = vmatpush3.bf16.msra.mxu1 %v694_v14 }
  0x60   : > { %592 = vmatprep.subr.bf16.mxu0 %v825_v0  ;;  %612 = vmatprep.subr.bf16.mxu1 %v825_v0 }
  0x63   : > { %593 = vmatpush3.bf16.msra.mxu0 %v687_v11  ;;  %613 = vmatpush3.bf16.msra.mxu1 %v695_v16 }
  0x64   : > { %594 = vmatprep.subr.bf16.mxu0 %v825_v0  ;;  %614 = vmatprep.subr.bf16.mxu1 %v825_v0 }
  0x67   : > { %595 = vmatpush3.bf16.msra.mxu0 %v688_v13  ;;  %615 = vmatpush3.bf16.msra.mxu1 %v696_v17 }
  0x6a   : > { %597 = vmatmul.mubr.bf16.vlgmr.msra.gmra.mxu0 %v202_v15 }
 0x12a   : > { %v308_v19 = vpop.f32.mrf.mxu0 }
 0x12b   : > { %v309_v20 = vadd.f32 %v539_v18, %v308_v19 }
 0x12c   : > { %v598_v21 = vpop.f32.mrf.mxu0 }
 0x12d   : > { %vm314_vm1 = vcmp.ge.f32.partialorder %v309_v20, 0.0  ;;  %v315_v22 = vmul.f32 0.01, %v309_v20 }
 0x12e   : > { %v311_v23 = vpop.f32.mrf.mxu0 }
 0x12f   : > { %v316_v24 = vsel %vm314_vm1, %v309_v20, %v315_v22 }
 0x130   : > { %v599_v25 = vpop.f32.mrf.mxu0  ;;  %v317_v26 = vpack.c.bf16 %v316_v24, %v316_v24 }
 0x132   : > { %617 = vmatmul.mubr.bf16.vlgmr.msra.gmra.mxu1 %v317_v26 }
 0x1f2   : > { %v425_v28 = vpop.f32.mrf.mxu1 }
 0x1f3   : > { %v426_v29 = vadd.f32 %v549_v27, %v425_v28 }
 0x1f4   : > { %v618_v30 = vpop.f32.mrf.mxu1 }
 0x1f5   : > { %vm431_vm2 = vcmp.ge.f32.partialorder %v426_v29, 0.0  ;;  %v432_v31 = vmul.f32 0.01, %v426_v29 }
 0x1f6   : > { %v428_v32 = vpop.f32.mrf.mxu1 }
 0x1f7   : > { %v433_v33 = vsel %vm431_vm2, %v426_v29, %v432_v31 }
 0x1f8   : > { %v619_v34 = vpop.f32.mrf.mxu1  ;;  %434 = vst [vmem:[%s200_s28] sm:$0xff] %v433_v33 }
 0x1f9   : > { %764 = shalt.err (!%p761_p0)
}
 0x1fa   : > { %s765_s26 = scalar_lea.hbm %s980_s8, 128  ;;  %s769_s18 = scalar_lea.hbm %s1025_s3, 384 }
 0x1fb   : > { %p766_p5 = scmp.ne.s32.totalorder %s980_s8, %s765_s26  ;;  %p770_p1 = scmp.lt.s32.totalorder %s980_s8, %s1025_s3 }
 0x1fc   : > { %p771_p4 = scmp.lt.s32.totalorder %s769_s18, %s765_s26 }
 0x1fd   : > { %p767_p9 = pnand %p766_p5, %p1041_p3 }
 0x1fe   : > { %p772_p6 = por %p771_p4, %p770_p1 }
 0x1ff   : > { %p768_p11 = pneg %p767_p9 }
 0x201   : > { %p773_p8 = pnand %p772_p6, %p768_p11 }
 0x203   : > { %776 = shalt.err (!%p773_p8)
}
 0x204   : > { %626 = dma.vmem_to_hbm [thread:$0]  (%p1041_p3), %s982_s29, 128, %s980_s8, %s436_s16  }
 0x205 PF: > { %p643_p10 = scmp.ge.s32.totalorder %s819_s15, 2  ;;  %s461_s22 = sand.u32 1, %s807_s12  }
 0x206   : > { %p1042_p7 = scmp.ne.s32.totalorder %s1031_s19, 0  ;;  %s462_s23 = scalar_lea.sflag [#allocation4], %s461_s22 }
 0x208   : > { %p637_p12 = pnand %p643_p10, %p1042_p7 }
 0x20a   : > { %p638_p2 = pneg %p637_p12 }
 0x20c   : > { %802 = dma.done.wait (%p638_p2), %s462_s23, 128  }
 0x20d   : > { %804 = vsyncadd (%p638_p2), %s462_s23, 4294967168  ;;  %p17_p13 = scmp.ge.s32.totalorder %s901_s24, 5   ;;  %s1043_s12 = smov %s811_s13 }
 0x20e   : > { %s1044_s13 = smov %s815_s14  ;;  %s1045_s14 = smov %s918_s5 }
 0x20f   : > { %s1046_s15 = smov %s901_s24  ;;  %19 = sbr.rel (!%p17_p13) target bundleno = 6 (0x6), region = 83 }
 0x214   :  { %467 = vsyncpa [#allocation3], 1 }
 0x215   :  { %469 = vsyncpa [#allocation3 + $0x1], 1 }
 0x216   :  { %470 = vsyncpa [#allocation6], 1 }
 0x217   :  { %471 = vsyncpa [#allocation4], 1 }
 0x218   :  { %473 = vsyncpa [#allocation4 + $0x1], 1 }

</bundles_post_ra>
